<compile_context>
chip_gen: v7x
topology: tpu7x:2x2x1
jax: 0.10.0
libtpu: 0.0.40
codegen_flags: <defaults>
</compile_context>

<pallas_src>
import functools

import jax
import jax.numpy as jnp
from jax.experimental import pallas as pl
from jax.experimental.pallas import tpu as pltpu

# ---------------------------------------------------------------------------
# Static module configuration (defaults of HyperSheetMLP)
# ---------------------------------------------------------------------------
NUM_LAYERS = 6
HIDDEN = 64
SKIP_EVERY = 4
NUM_ENC_XYZ = 10
DIM_XYZ = 3 + 2 * 3 * NUM_ENC_XYZ             # 63
DIM_DRIVING = 76
DIM_POSE = 6 + 2 * 6 * 3                      # 42
INPUT_DIM = DIM_XYZ + DIM_DRIVING + DIM_POSE  # 181
AMBIENT_DIM = 1


# ---------------------------------------------------------------------------
# Pallas kernel: the whole MLP forward for one tile of rows
# ---------------------------------------------------------------------------
def _hypersheet_kernel(x_ref, d_ref, p_ref,            # (TN,63),(TN,76),(TN,42)
                       wcx_ref, wcd_ref, wcp_ref,      # (63,128),(76,128),(42,128)
                       bc_ref,                         # (1,128) = [b0 | bskip]
                       wmid_ref, bmid_ref,             # (4,64,64),(4,1,64) layers 1,2,3,5
                       wsh_ref,                        # (64,64) skip layer, h part
                       wf_ref, bf_ref,                 # (64,1),(1,1) fc_ambient
                       out_ref,                        # (TN,1)
                       *, compute_dtype):
    f32 = jnp.float32
    cdt = compute_dtype

    x = x_ref[...].astype(cdt)
    d = d_ref[...].astype(cdt)
    p = p_ref[...].astype(cdt)

    # Fused [layer-0 | skip-initial] matmul (output width 2*HIDDEN = 128):
    #   z[:, :64] = cat(x,d,p) @ W0         + b0
    #   z[:, 64:] = cat(x,d,p) @ Wskip_init + bskip     (held for layer 4)
    z = (jnp.dot(x, wcx_ref[...], preferred_element_type=f32)
         + jnp.dot(d, wcd_ref[...], preferred_element_type=f32)
         + jnp.dot(p, wcp_ref[...], preferred_element_type=f32)
         + bc_ref[...])
    h = jnp.maximum(z[:, :HIDDEN], 0.0)        # layer 0 + ReLU
    skip_pre = z[:, HIDDEN:]                   # pre-activation skip contribution

    # layers 1, 2, 3 (plain hidden layers)
    for k in range(3):
        h = jnp.dot(h.astype(cdt), wmid_ref[k], preferred_element_type=f32) + bmid_ref[k]
        h = jnp.maximum(h, 0.0)

    # layer 4 (skip): Linear(cat(h, initial)) = h @ Wh + initial @ Winit + bskip
    h = jnp.dot(h.astype(cdt), wsh_ref[...], preferred_element_type=f32) + skip_pre
    h = jnp.maximum(h, 0.0)

    # layer 5
    h = jnp.dot(h.astype(cdt), wmid_ref[3], preferred_element_type=f32) + bmid_ref[3]
    h = jnp.maximum(h, 0.0)

    # fc_ambient: plain linear, no activation
    out = jnp.dot(h.astype(cdt), wf_ref[...], preferred_element_type=f32) + bf_ref[...]
    out_ref[...] = out.astype(out_ref.dtype)


# ---------------------------------------------------------------------------
# Wrapper
# ---------------------------------------------------------------------------
@functools.partial(jax.jit, static_argnames=("tile_n", "compute_dtype"))
def hyper_sheet_mlp(x, driving, pose, params, *, tile_n=2048,
                    compute_dtype=jnp.bfloat16):
    """x: (N, 63), driving: (N, 76), pose: (N, 42) -> ambient: (N, 1)."""
    n = x.shape[0]
    # Do not over-allocate for tiny batches; keep sublane multiple of 8.
    tile_n = max(8, min(tile_n, pl.cdiv(n, 8) * 8))
    n_pad = pl.cdiv(n, tile_n) * tile_n
    if n_pad != n:
        pad = ((0, n_pad - n), (0, 0))
        x = jnp.pad(x, pad)
        driving = jnp.pad(driving, pad)
        pose = jnp.pad(pose, pad)

    cdt = compute_dtype
    # Column-fuse layer-0 and the skip layer's initial-facing weights so the
    # kernel streams `initial` through the MXU once (tiny host-side concats).
    wcx = jnp.concatenate([params["w0_x"], params["wskip_x"]], axis=1).astype(cdt)
    wcd = jnp.concatenate([params["w0_d"], params["wskip_d"]], axis=1).astype(cdt)
    wcp = jnp.concatenate([params["w0_p"], params["wskip_p"]], axis=1).astype(cdt)
    bc = jnp.concatenate([params["b0"], params["bskip"]], axis=1)       # f32 (1,128)
    wmid = params["wmid"].astype(cdt)
    wsh = params["wskip_h"].astype(cdt)
    wf = params["wf"].astype(cdt)

    grid = (n_pad // tile_n,)
    full = lambda *shape: pl.BlockSpec(shape, lambda i: (0,) * len(shape))
    row = lambda width: pl.BlockSpec((tile_n, width), lambda i: (i, 0))

    macs = INPUT_DIM * (2 * HIDDEN) + 5 * HIDDEN * HIDDEN + HIDDEN * AMBIENT_DIM
    weight_bytes = 2 * (INPUT_DIM * 2 * HIDDEN + 5 * HIDDEN * HIDDEN + HIDDEN) + 4 * 1024
    cost = pl.CostEstimate(
        flops=2 * n_pad * macs,
        transcendentals=0,
        bytes_accessed=n_pad * 4 * (INPUT_DIM + AMBIENT_DIM) + weight_bytes,
    )

    kernel = functools.partial(_hypersheet_kernel, compute_dtype=cdt)

    out = pl.pallas_call(
        kernel,
        out_shape=jax.ShapeDtypeStruct((n_pad, AMBIENT_DIM), jnp.float32),
        grid_spec=pltpu.PrefetchScalarGridSpec(
            num_scalar_prefetch=0,
            grid=grid,
            in_specs=[
                row(DIM_XYZ), row(DIM_DRIVING), row(DIM_POSE),            # inputs
                full(DIM_XYZ, 2 * HIDDEN), full(DIM_DRIVING, 2 * HIDDEN),
                full(DIM_POSE, 2 * HIDDEN), full(1, 2 * HIDDEN),          # fused L0|skip-init
                full(4, HIDDEN, HIDDEN), full(4, 1, HIDDEN),              # layers 1,2,3,5
                full(HIDDEN, HIDDEN),                                     # skip layer, h part
                full(HIDDEN, AMBIENT_DIM), full(1, AMBIENT_DIM),          # fc_ambient
            ],
            out_specs=pl.BlockSpec((tile_n, AMBIENT_DIM), lambda i: (i, 0)),
        ),
        compiler_params=pltpu.CompilerParams(
            dimension_semantics=("parallel",),
            vmem_limit_bytes=32 * 1024 * 1024,
        ),
        cost_estimate=cost,
    )(
        x, driving, pose,
        wcx, wcd, wcp, bc,
        wmid, params["bmid"],
        wsh,
        wf, params["bf"],
    )
    return out[:n]


# ---------------------------------------------------------------------------
# Deterministic parameter init (synthetic; mimics torch.nn.Linear shapes)
# ---------------------------------------------------------------------------
def init_params(key):
    ks = jax.random.split(key, 14)

    def linear(kw, kb, fan_in, fan_out):
        lim = 1.0 / jnp.sqrt(fan_in)
        w = jax.random.uniform(kw, (fan_in, fan_out), jnp.float32, -lim, lim)
        b = jax.random.uniform(kb, (1, fan_out), jnp.float32, -lim, lim)
        return w, b

    w0, b0 = linear(ks[0], ks[1], INPUT_DIM, HIDDEN)
    wmid, bmid = [], []
    for j in range(4):                       # layers 1, 2, 3, 5
        w, b = linear(ks[2 + 2 * j], ks[3 + 2 * j], HIDDEN, HIDDEN)
        wmid.append(w)
        bmid.append(b)
    wmid = jnp.stack(wmid)                   # (4, 64, 64)
    bmid = jnp.stack(bmid)                   # (4, 1, 64)
    wskip, bskip = linear(ks[10], ks[11], HIDDEN + INPUT_DIM, HIDDEN)   # layer 4
    wf, bf = linear(ks[12], ks[13], HIDDEN, AMBIENT_DIM)

    # Split concatenation-facing weights so the kernel never concatenates activations.
    o = 0
    w0_x = w0[o:o + DIM_XYZ]; o += DIM_XYZ
    w0_d = w0[o:o + DIM_DRIVING]; o += DIM_DRIVING
    w0_p = w0[o:o + DIM_POSE]
    o = 0
    wskip_h = wskip[o:o + HIDDEN]; o += HIDDEN
    wskip_x = wskip[o:o + DIM_XYZ]; o += DIM_XYZ
    wskip_d = wskip[o:o + DIM_DRIVING]; o += DIM_DRIVING
    wskip_p = wskip[o:o + DIM_POSE]

    return dict(w0_x=w0_x, w0_d=w0_d, w0_p=w0_p, b0=b0,
                wmid=wmid, bmid=bmid,
                wskip_h=wskip_h, wskip_x=wskip_x, wskip_d=wskip_d, wskip_p=wskip_p,
                bskip=bskip, wf=wf, bf=bf)


# ---------------------------------------------------------------------------
# Pure-JAX reference (mirrors the PyTorch forward) for sanity checking
# ---------------------------------------------------------------------------
def reference(x, driving, pose, p):
    hp = jax.lax.Precision.HIGHEST
    initial = jnp.concatenate([x, driving, pose], axis=1)
    w0 = jnp.concatenate([p["w0_x"], p["w0_d"], p["w0_p"]], axis=0)
    wskip = jnp.concatenate([p["wskip_h"], p["wskip_x"], p["wskip_d"], p["wskip_p"]], axis=0)
    h = jax.nn.relu(jnp.dot(initial, w0, precision=hp) + p["b0"])
    mid = 0
    for i in range(1, NUM_LAYERS):
        if i == SKIP_EVERY:
            h = jax.nn.relu(
                jnp.dot(jnp.concatenate([h, initial], axis=-1), wskip, precision=hp)
                + p["bskip"])
        else:
            h = jax.nn.relu(jnp.dot(h, p["wmid"][mid], precision=hp) + p["bmid"][mid])
            mid += 1
    return jnp.dot(h, p["wf"], precision=hp) + p["bf"]   # no activation on fc_ambient


if __name__ == "__main__":
    key = jax.random.PRNGKey(0)
    kp, kx, kd, kpo = jax.random.split(key, 4)
    params = init_params(kp)

    def make_inputs(n):
        return (jax.random.normal(kx, (n, DIM_XYZ), jnp.float32),
                jax.random.normal(kd, (n, DIM_DRIVING), jnp.float32),
                jax.random.normal(kpo, (n, DIM_POSE), jnp.float32))

    # 1) tiny batch, exact f32 MXU path
    x, d, p = make_inputs(16)
    ref = reference(x, d, p, params)
    out = jax.block_until_ready(
        hyper_sheet_mlp(x, d, p, params, compute_dtype=jnp.float32))
    assert out.shape == (16, AMBIENT_DIM)
    assert jnp.allclose(out, ref, atol=1e-3, rtol=1e-3), "f32 mismatch (tiny batch)"

    # 2) tiny batch, default bf16 fast path
    out = jax.block_until_ready(hyper_sheet_mlp(x, d, p, params))
    assert out.shape == (16, AMBIENT_DIM)
    assert jnp.allclose(out, ref, atol=1e-1, rtol=1e-1), "bf16 mismatch (tiny batch)"

    # 3) multi-tile grid with row padding (N not a multiple of tile_n), exact path
    x, d, p = make_inputs(1200)
    ref = reference(x, d, p, params)
    out = jax.block_until_ready(
        hyper_sheet_mlp(x, d, p, params, tile_n=256, compute_dtype=jnp.float32))
    assert out.shape == (1200, AMBIENT_DIM)
    assert jnp.allclose(out, ref, atol=1e-3, rtol=1e-3), "f32 mismatch (multi-tile)"

    # 4) default config (tile_n=2048 clamp, bf16) spanning several tiles + padding
    x, d, p = make_inputs(5000)
    ref = reference(x, d, p, params)
    out = jax.block_until_ready(hyper_sheet_mlp(x, d, p, params))
    assert out.shape == (5000, AMBIENT_DIM)
    assert jnp.allclose(out, ref, atol=2e-1, rtol=2e-1), "bf16 mismatch (default config)"

    print("KERNEL_OK")
</pallas_src>

<mosaic_0001>
module attributes {stable_mosaic.version = 11 : i64} {
  func.func @_hypersheet_kernel(%arg0: i32, %arg1: memref<16x63xf32, #tpu.memory_space<vmem>>, %arg2: memref<16x76xf32, #tpu.memory_space<vmem>>, %arg3: memref<16x42xf32, #tpu.memory_space<vmem>>, %arg4: memref<63x128xf32, #tpu.memory_space<vmem>>, %arg5: memref<76x128xf32, #tpu.memory_space<vmem>>, %arg6: memref<42x128xf32, #tpu.memory_space<vmem>>, %arg7: memref<1x128xf32, #tpu.memory_space<vmem>>, %arg8: memref<4x64x64xf32, #tpu.memory_space<vmem>>, %arg9: memref<4x1x64xf32, #tpu.memory_space<vmem>>, %arg10: memref<64x64xf32, #tpu.memory_space<vmem>>, %arg11: memref<64x1xf32, #tpu.memory_space<vmem>>, %arg12: memref<1x1xf32, #tpu.memory_space<vmem>>, %arg13: memref<16x1xf32, #tpu.memory_space<vmem>>) attributes {dimension_semantics = [#tpu.dimension_semantics<parallel>], iteration_bounds = array<i64: 1>, scalar_prefetch = 0 : i64, scratch_operands = 0 : i64, tpu.core_type = #tpu.core_type<tc>, window_params = [{transform_indices = @transform_0, window_bounds = array<i64: 16, 63>}, {transform_indices = @transform_1, window_bounds = array<i64: 16, 76>}, {transform_indices = @transform_2, window_bounds = array<i64: 16, 42>}, {pipeline_mode = #tpu.pipeline_mode<synchronous>, transform_indices = @transform_3, window_bounds = array<i64: 63, 128>}, {pipeline_mode = #tpu.pipeline_mode<synchronous>, transform_indices = @transform_4, window_bounds = array<i64: 76, 128>}, {pipeline_mode = #tpu.pipeline_mode<synchronous>, transform_indices = @transform_5, window_bounds = array<i64: 42, 128>}, {pipeline_mode = #tpu.pipeline_mode<synchronous>, transform_indices = @transform_6, window_bounds = array<i64: 1, 128>}, {pipeline_mode = #tpu.pipeline_mode<synchronous>, transform_indices = @transform_7, window_bounds = array<i64: 4, 64, 64>}, {pipeline_mode = #tpu.pipeline_mode<synchronous>, transform_indices = @transform_8, window_bounds = array<i64: 4, 1, 64>}, {pipeline_mode = #tpu.pipeline_mode<synchronous>, transform_indices = @transform_9, window_bounds = array<i64: 64, 64>}, {pipeline_mode = #tpu.pipeline_mode<synchronous>, transform_indices = @transform_10, window_bounds = array<i64: 64, 1>}, {pipeline_mode = #tpu.pipeline_mode<synchronous>, transform_indices = @transform_11, window_bounds = array<i64: 1, 1>}, {transform_indices = @transform_12, window_bounds = array<i64: 16, 1>}]} {
    %c0 = arith.constant 0 : index
    %c0_0 = arith.constant 0 : index
    %0 = vector.load %arg1[%c0, %c0_0] : memref<16x63xf32, #tpu.memory_space<vmem>>, vector<16x63xf32>
    %c0_1 = arith.constant 0 : index
    %c0_2 = arith.constant 0 : index
    %1 = vector.load %arg2[%c0_1, %c0_2] : memref<16x76xf32, #tpu.memory_space<vmem>>, vector<16x76xf32>
    %c0_3 = arith.constant 0 : index
    %c0_4 = arith.constant 0 : index
    %2 = vector.load %arg3[%c0_3, %c0_4] : memref<16x42xf32, #tpu.memory_space<vmem>>, vector<16x42xf32>
    %c0_5 = arith.constant 0 : index
    %c0_6 = arith.constant 0 : index
    %3 = vector.load %arg4[%c0_5, %c0_6] : memref<63x128xf32, #tpu.memory_space<vmem>>, vector<63x128xf32>
    %cst = arith.constant dense<0.000000e+00> : vector<16x128xf32>
    %4 = tpu.matmul %0, %3, %cst {dimension_numbers = #tpu.dot_dimension_numbers<[1], [0], [0], [1], [0, 0, 1, 1], [], []>} : vector<16x63xf32>, vector<63x128xf32>, vector<16x128xf32> -> vector<16x128xf32>
    %c0_7 = arith.constant 0 : index
    %c0_8 = arith.constant 0 : index
    %5 = vector.load %arg5[%c0_7, %c0_8] : memref<76x128xf32, #tpu.memory_space<vmem>>, vector<76x128xf32>
    %cst_9 = arith.constant dense<0.000000e+00> : vector<16x128xf32>
    %6 = tpu.matmul %1, %5, %cst_9 {dimension_numbers = #tpu.dot_dimension_numbers<[1], [0], [0], [1], [0, 0, 1, 1], [], []>} : vector<16x76xf32>, vector<76x128xf32>, vector<16x128xf32> -> vector<16x128xf32>
    %7 = arith.addf %4, %6 : vector<16x128xf32>
    %c0_10 = arith.constant 0 : index
    %c0_11 = arith.constant 0 : index
    %8 = vector.load %arg6[%c0_10, %c0_11] : memref<42x128xf32, #tpu.memory_space<vmem>>, vector<42x128xf32>
    %cst_12 = arith.constant dense<0.000000e+00> : vector<16x128xf32>
    %9 = tpu.matmul %2, %8, %cst_12 {dimension_numbers = #tpu.dot_dimension_numbers<[1], [0], [0], [1], [0, 0, 1, 1], [], []>} : vector<16x42xf32>, vector<42x128xf32>, vector<16x128xf32> -> vector<16x128xf32>
    %10 = arith.addf %7, %9 : vector<16x128xf32>
    %c0_13 = arith.constant 0 : index
    %c0_14 = arith.constant 0 : index
    %11 = vector.load %arg7[%c0_13, %c0_14] : memref<1x128xf32, #tpu.memory_space<vmem>>, vector<1x128xf32>
    %12 = vector.broadcast %11 : vector<1x128xf32> to vector<16x128xf32>
    %13 = arith.addf %10, %12 : vector<16x128xf32>
    %14 = vector.extract_strided_slice %13 {offsets = [0, 0], sizes = [16, 64], strides = [1, 1]} : vector<16x128xf32> to vector<16x64xf32>
    %cst_15 = arith.constant 0.000000e+00 : f32
    %15 = vector.broadcast %cst_15 : f32 to vector<16x64xf32>
    %16 = arith.maximumf %14, %15 : vector<16x64xf32>
    %17 = vector.extract_strided_slice %13 {offsets = [0, 64], sizes = [16, 64], strides = [1, 1]} : vector<16x128xf32> to vector<16x64xf32>
    %c0_16 = arith.constant 0 : index
    %c0_17 = arith.constant 0 : index
    %c0_18 = arith.constant 0 : index
    %18 = vector.load %arg8[%c0_16, %c0_17, %c0_18] : memref<4x64x64xf32, #tpu.memory_space<vmem>>, vector<1x64x64xf32>
    %19 = vector.shape_cast %18 : vector<1x64x64xf32> to vector<64x64xf32>
    %cst_19 = arith.constant dense<0.000000e+00> : vector<16x64xf32>
    %20 = tpu.matmul %16, %19, %cst_19 {dimension_numbers = #tpu.dot_dimension_numbers<[1], [0], [0], [1], [0, 0, 1, 1], [], []>} : vector<16x64xf32>, vector<64x64xf32>, vector<16x64xf32> -> vector<16x64xf32>
    %c0_20 = arith.constant 0 : index
    %c0_21 = arith.constant 0 : index
    %c0_22 = arith.constant 0 : index
    %21 = vector.load %arg9[%c0_20, %c0_21, %c0_22] : memref<4x1x64xf32, #tpu.memory_space<vmem>>, vector<1x1x64xf32>
    %22 = vector.shape_cast %21 : vector<1x1x64xf32> to vector<1x64xf32>
    %23 = vector.broadcast %22 : vector<1x64xf32> to vector<16x64xf32>
    %24 = arith.addf %20, %23 : vector<16x64xf32>
    %cst_23 = arith.constant 0.000000e+00 : f32
    %25 = vector.broadcast %cst_23 : f32 to vector<16x64xf32>
    %26 = arith.maximumf %24, %25 : vector<16x64xf32>
    %c1 = arith.constant 1 : index
    %c0_24 = arith.constant 0 : index
    %c0_25 = arith.constant 0 : index
    %27 = vector.load %arg8[%c1, %c0_24, %c0_25] : memref<4x64x64xf32, #tpu.memory_space<vmem>>, vector<1x64x64xf32>
    %28 = vector.shape_cast %27 : vector<1x64x64xf32> to vector<64x64xf32>
    %cst_26 = arith.constant dense<0.000000e+00> : vector<16x64xf32>
    %29 = tpu.matmul %26, %28, %cst_26 {dimension_numbers = #tpu.dot_dimension_numbers<[1], [0], [0], [1], [0, 0, 1, 1], [], []>} : vector<16x64xf32>, vector<64x64xf32>, vector<16x64xf32> -> vector<16x64xf32>
    %c1_27 = arith.constant 1 : index
    %c0_28 = arith.constant 0 : index
    %c0_29 = arith.constant 0 : index
    %30 = vector.load %arg9[%c1_27, %c0_28, %c0_29] : memref<4x1x64xf32, #tpu.memory_space<vmem>>, vector<1x1x64xf32>
    %31 = vector.shape_cast %30 : vector<1x1x64xf32> to vector<1x64xf32>
    %32 = vector.broadcast %31 : vector<1x64xf32> to vector<16x64xf32>
    %33 = arith.addf %29, %32 : vector<16x64xf32>
    %cst_30 = arith.constant 0.000000e+00 : f32
    %34 = vector.broadcast %cst_30 : f32 to vector<16x64xf32>
    %35 = arith.maximumf %33, %34 : vector<16x64xf32>
    %c2 = arith.constant 2 : index
    %c0_31 = arith.constant 0 : index
    %c0_32 = arith.constant 0 : index
    %36 = vector.load %arg8[%c2, %c0_31, %c0_32] : memref<4x64x64xf32, #tpu.memory_space<vmem>>, vector<1x64x64xf32>
    %37 = vector.shape_cast %36 : vector<1x64x64xf32> to vector<64x64xf32>
    %cst_33 = arith.constant dense<0.000000e+00> : vector<16x64xf32>
    %38 = tpu.matmul %35, %37, %cst_33 {dimension_numbers = #tpu.dot_dimension_numbers<[1], [0], [0], [1], [0, 0, 1, 1], [], []>} : vector<16x64xf32>, vector<64x64xf32>, vector<16x64xf32> -> vector<16x64xf32>
    %c2_34 = arith.constant 2 : index
    %c0_35 = arith.constant 0 : index
    %c0_36 = arith.constant 0 : index
    %39 = vector.load %arg9[%c2_34, %c0_35, %c0_36] : memref<4x1x64xf32, #tpu.memory_space<vmem>>, vector<1x1x64xf32>
    %40 = vector.shape_cast %39 : vector<1x1x64xf32> to vector<1x64xf32>
    %41 = vector.broadcast %40 : vector<1x64xf32> to vector<16x64xf32>
    %42 = arith.addf %38, %41 : vector<16x64xf32>
    %cst_37 = arith.constant 0.000000e+00 : f32
    %43 = vector.broadcast %cst_37 : f32 to vector<16x64xf32>
    %44 = arith.maximumf %42, %43 : vector<16x64xf32>
    %c0_38 = arith.constant 0 : index
    %c0_39 = arith.constant 0 : index
    %45 = vector.load %arg10[%c0_38, %c0_39] : memref<64x64xf32, #tpu.memory_space<vmem>>, vector<64x64xf32>
    %cst_40 = arith.constant dense<0.000000e+00> : vector<16x64xf32>
    %46 = tpu.matmul %44, %45, %cst_40 {dimension_numbers = #tpu.dot_dimension_numbers<[1], [0], [0], [1], [0, 0, 1, 1], [], []>} : vector<16x64xf32>, vector<64x64xf32>, vector<16x64xf32> -> vector<16x64xf32>
    %47 = arith.addf %46, %17 : vector<16x64xf32>
    %cst_41 = arith.constant 0.000000e+00 : f32
    %48 = vector.broadcast %cst_41 : f32 to vector<16x64xf32>
    %49 = arith.maximumf %47, %48 : vector<16x64xf32>
    %c3 = arith.constant 3 : index
    %c0_42 = arith.constant 0 : index
    %c0_43 = arith.constant 0 : index
    %50 = vector.load %arg8[%c3, %c0_42, %c0_43] : memref<4x64x64xf32, #tpu.memory_space<vmem>>, vector<1x64x64xf32>
    %51 = vector.shape_cast %50 : vector<1x64x64xf32> to vector<64x64xf32>
    %cst_44 = arith.constant dense<0.000000e+00> : vector<16x64xf32>
    %52 = tpu.matmul %49, %51, %cst_44 {dimension_numbers = #tpu.dot_dimension_numbers<[1], [0], [0], [1], [0, 0, 1, 1], [], []>} : vector<16x64xf32>, vector<64x64xf32>, vector<16x64xf32> -> vector<16x64xf32>
    %c3_45 = arith.constant 3 : index
    %c0_46 = arith.constant 0 : index
    %c0_47 = arith.constant 0 : index
    %53 = vector.load %arg9[%c3_45, %c0_46, %c0_47] : memref<4x1x64xf32, #tpu.memory_space<vmem>>, vector<1x1x64xf32>
    %54 = vector.shape_cast %53 : vector<1x1x64xf32> to vector<1x64xf32>
    %55 = vector.broadcast %54 : vector<1x64xf32> to vector<16x64xf32>
    %56 = arith.addf %52, %55 : vector<16x64xf32>
    %cst_48 = arith.constant 0.000000e+00 : f32
    %57 = vector.broadcast %cst_48 : f32 to vector<16x64xf32>
    %58 = arith.maximumf %56, %57 : vector<16x64xf32>
    %c0_49 = arith.constant 0 : index
    %c0_50 = arith.constant 0 : index
    %59 = vector.load %arg11[%c0_49, %c0_50] : memref<64x1xf32, #tpu.memory_space<vmem>>, vector<64x1xf32>
    %cst_51 = arith.constant dense<0.000000e+00> : vector<16x1xf32>
    %60 = tpu.matmul %58, %59, %cst_51 {dimension_numbers = #tpu.dot_dimension_numbers<[1], [0], [0], [1], [0, 0, 1, 1], [], []>} : vector<16x64xf32>, vector<64x1xf32>, vector<16x1xf32> -> vector<16x1xf32>
    %c0_52 = arith.constant 0 : index
    %c0_53 = arith.constant 0 : index
    %61 = vector.load %arg12[%c0_52, %c0_53] : memref<1x1xf32, #tpu.memory_space<vmem>>, vector<1x1xf32>
    %62 = vector.broadcast %61 : vector<1x1xf32> to vector<16x1xf32>
    %63 = arith.addf %60, %62 : vector<16x1xf32>
    %c0_54 = arith.constant 0 : index
    %c0_55 = arith.constant 0 : index
    %64 = vector.load %arg13[%c0_54, %c0_55] : memref<16x1xf32, #tpu.memory_space<vmem>>, vector<16x1xf32>
    tpu.vector_store %arg13[%c0_54, %c0_55], %63 {strides = array<i32>} : memref<16x1xf32, #tpu.memory_space<vmem>>, vector<16x1xf32>,
    return
  }
  func.func @transform_0(%arg0: i32) -> (i32, i32) {
    %c0_i32 = arith.constant 0 : i32
    %c0_i32_0 = arith.constant 0 : i32
    return %arg0, %c0_i32 : i32, i32
  }
  func.func @transform_1(%arg0: i32) -> (i32, i32) {
    %c0_i32 = arith.constant 0 : i32
    %c0_i32_0 = arith.constant 0 : i32
    return %arg0, %c0_i32 : i32, i32
  }
  func.func @transform_2(%arg0: i32) -> (i32, i32) {
    %c0_i32 = arith.constant 0 : i32
    %c0_i32_0 = arith.constant 0 : i32
    return %arg0, %c0_i32 : i32, i32
  }
  func.func @transform_3(%arg0: i32) -> (i32, i32) {
    %c0_i32 = arith.constant 0 : i32
    %c0_i32_0 = arith.constant 0 : i32
    %c0_i32_1 = arith.constant 0 : i32
    return %c0_i32, %c0_i32_0 : i32, i32
  }
  func.func @transform_4(%arg0: i32) -> (i32, i32) {
    %c0_i32 = arith.constant 0 : i32
    %c0_i32_0 = arith.constant 0 : i32
    %c0_i32_1 = arith.constant 0 : i32
    return %c0_i32, %c0_i32_0 : i32, i32
  }
  func.func @transform_5(%arg0: i32) -> (i32, i32) {
    %c0_i32 = arith.constant 0 : i32
    %c0_i32_0 = arith.constant 0 : i32
    %c0_i32_1 = arith.constant 0 : i32
    return %c0_i32, %c0_i32_0 : i32, i32
  }
  func.func @transform_6(%arg0: i32) -> (i32, i32) {
    %c0_i32 = arith.constant 0 : i32
    %c0_i32_0 = arith.constant 0 : i32
    %c0_i32_1 = arith.constant 0 : i32
    return %c0_i32, %c0_i32_0 : i32, i32
  }
  func.func @transform_7(%arg0: i32) -> (i32, i32, i32) {
    %c0_i32 = arith.constant 0 : i32
    %c0_i32_0 = arith.constant 0 : i32
    %c0_i32_1 = arith.constant 0 : i32
    %c0_i32_2 = arith.constant 0 : i32
    return %c0_i32, %c0_i32_0, %c0_i32_1 : i32, i32, i32
  }
  func.func @transform_8(%arg0: i32) -> (i32, i32, i32) {
    %c0_i32 = arith.constant 0 : i32
    %c0_i32_0 = arith.constant 0 : i32
    %c0_i32_1 = arith.constant 0 : i32
    %c0_i32_2 = arith.constant 0 : i32
    return %c0_i32, %c0_i32_0, %c0_i32_1 : i32, i32, i32
  }
  func.func @transform_9(%arg0: i32) -> (i32, i32) {
    %c0_i32 = arith.constant 0 : i32
    %c0_i32_0 = arith.constant 0 : i32
    %c0_i32_1 = arith.constant 0 : i32
    return %c0_i32, %c0_i32_0 : i32, i32
  }
  func.func @transform_10(%arg0: i32) -> (i32, i32) {
    %c0_i32 = arith.constant 0 : i32
    %c0_i32_0 = arith.constant 0 : i32
    %c0_i32_1 = arith.constant 0 : i32
    return %c0_i32, %c0_i32_0 : i32, i32
  }
  func.func @transform_11(%arg0: i32) -> (i32, i32) {
    %c0_i32 = arith.constant 0 : i32
    %c0_i32_0 = arith.constant 0 : i32
    %c0_i32_1 = arith.constant 0 : i32
    return %c0_i32, %c0_i32_0 : i32, i32
  }
  func.func @transform_12(%arg0: i32) -> (i32, i32) {
    %c0_i32 = arith.constant 0 : i32
    %c0_i32_0 = arith.constant 0 : i32
    return %arg0, %c0_i32 : i32, i32
  }
}

</mosaic_0001>

<bundles_post_ra>
// kernel: hyper_sheet_mlp.1
= control target key start
LH: loop header
LB: loop body
LE: loop exit
PB: predicated region body
PF: predicated region fallthrough
CT: control target
= control target key end

     0   :  { %vm67_vm0 = vcmask 621568   ;;  %vm245_vm1 = vcmask 343040   ;;  %vm252_vm2 = vcmask 1041408   ;;  %vm74_vm3 = vcmask 1043456   ;;  %s1778_s4 = inlined_call_operand.vmem [shape: f32[76,128], index: 4, kind: input, shape index: {}]   ;;  %s1779_s1 = inlined_call_operand.vmem [shape: f32[16,76], index: 1, kind: input, shape index: {}]   ;;  %s1780_s5 = inlined_call_operand.vmem [shape: f32[42,128], index: 5, kind: input, shape index: {}]   ;;  %s1781_s2 = inlined_call_operand.vmem [shape: f32[16,42], index: 2, kind: input, shape index: {}]   ;;  %s1782_s7 = inlined_call_operand.vmem [shape: f32[4,64,64], index: 7, kind: input, shape index: {}]   ;;  %s1783_s3 = inlined_call_operand.vmem [shape: f32[63,128], index: 3, kind: input, shape index: {}]   ;;  %s1784_s0 = inlined_call_operand.vmem [shape: f32[16,63], index: 0, kind: input, shape index: {}]   ;;  %s1785_s6 = inlined_call_operand.vmem [shape: f32[1,128], index: 6, kind: input, shape index: {}]   ;;  %s1786_s8 = inlined_call_operand.vmem [shape: f32[4,1,64], index: 8, kind: input, shape index: {}]   ;;  %s1787_s9 = inlined_call_operand.vmem [shape: f32[64,64], index: 9, kind: input, shape index: {}]   ;;  %s1788_s10 = inlined_call_operand.vmem [shape: f32[64,1], index: 10, kind: input, shape index: {}]   ;;  %s1789_s11 = inlined_call_operand.<no memory space> [shape: f32[1,1], index: 11, kind: input, shape index: {}]   ;;  %s1790_s12 = inlined_call_operand.vmem [shape: f32[16,1], index: 12, kind: output, shape index: {}]  }
   0x1   :  { %v57_v0 = vld [vmem:[%s1778_s4] sm:$0xff]  ;;  %v58_v1 = vld [vmem:[%s1778_s4 + $0x8] sm:$0xff]  ;;  %v59_v2 = vld [vmem:[%s1778_s4 + $0x10] sm:$0xff]  ;;  %vm1416_vm4 = vmmov 1   ;;  %vm153_vm7 = vcmask 515072   ;;  %vm160_vm8 = vcmask 1046528  }
   0x2   :  { %v1260_v3 = vpack.c.bf16 %v58_v1, %v57_v0  ;;  %v60_v4 = vld [vmem:[%s1778_s4 + $0x18] sm:$0xff]  ;;  %v61_v6 = vld [vmem:[%s1778_s4 + $0x20] sm:$0xff]  ;;  %v62_v7 = vld [vmem:[%s1778_s4 + $0x28] sm:$0xff]  ;;  %vm359_vm10 = vcmask 523264   ;;  %vm938_vm11 = vcmask 7168  }
   0x3   :  { %v1264_v5 = vpack.c.bf16 %v60_v4, %v59_v2  ;;  %v45_v8 = vld [vmem:[%s1779_s1] sm:$0xff]  ;;  %v1268_v9 = vpack.c.bf16 %v62_v7, %v61_v6  ;;  %v63_v10 = vld [vmem:[%s1778_s4 + $0x30] sm:$0xff]  ;;  %v240_v12 = vld [vmem:[%s1780_s5 + $0x8] sm:$0xff] }
   0x4   :  { %1261 = vmatprep.subr.bf16.mxu0 %v1260_v3  ;;  %1109 = vmatprep.mubr.msk.f32.mxu0 %vm67_vm0, %v45_v8  ;;  %v239_v11 = vld [vmem:[%s1780_s5] sm:$0xff]  ;;  %v64_v13 = vld [vmem:[%s1778_s4 + $0x38] sm:$0xff]  ;;  %v241_v15 = vld [vmem:[%s1780_s5 + $0x10] sm:$0xff] }
   0x5   :  { %1263 = vmatpush3.bf16.msra.mxu0 %v1260_v3  ;;  %v1300_v14 = vpack.c.bf16 %v240_v12, %v239_v11  ;;  %v242_v16 = vld [vmem:[%s1780_s5 + $0x18] sm:$0xff]  ;;  %v243_v18 = vld [vmem:[%s1780_s5 + $0x20] sm:$0xff]  ;;  %v244_v19 = vld [vmem:[%s1780_s5 + $0x28] sm:$0x3]  ;;  %v1272_v20 = vpack.c.bf16 %v64_v13, %v63_v10 }
   0x6   :  { %1265 = vmatprep.subr.bf16.mxu0 %v1264_v5  ;;  %v1304_v17 = vpack.c.bf16 %v242_v16, %v241_v15  ;;  %v47_v21 = vld [vmem:[%s1781_s2] sm:$0xff]  ;;  %v66_v23 = vld [vmem:[%s1778_s4 + $0x48] sm:$0xf]  ;;  %v1308_v24 = vpack.c.bf16 %v244_v19, %v243_v18  ;;  %vm1540_vm5 = vmpackc.low %vm252_vm2, %vm1416_vm4 }
   0x7   :  { %1301 = vmatprep.subr.bf16.mxu1 %v1300_v14  ;;  %v65_v22 = vld [vmem:[%s1778_s4 + $0x40] sm:$0xff]  ;;  %1143 = vmatprep.mubr.msk.f32.mxu1 %vm245_vm1, %v47_v21  ;;  %v345_v27 = vld [vmem:[%s1782_s7 + $0x8] sm:$0xff]  ;;  %vm1551_vm6 = vmpackc.low %vm74_vm3, %vm1416_vm4 }
   0x8   :  { %1303 = vmatpush3.bf16.msra.mxu1 %v1300_v14  ;;  %v344_v26 = vld [vmem:[%s1782_s7] sm:$0xff]  ;;  %v1276_v28 = vpack.c.bf16 %v66_v23, %v65_v22  ;;  %v50_v31 = vld [vmem:[%s1783_s3 + $0x8] sm:$0xff]  ;;  %v346_v33 = vld [vmem:[%s1782_s7 + $0x10] sm:$0xff] }
   0x9   :  { %1267 = vmatpush3.bf16.msra.mxu0 %v1264_v5  ;;  %1305 = vmatprep.subr.bf16.mxu1 %v1304_v17  ;;  %v49_v30 = vld [vmem:[%s1783_s3] sm:$0xff]  ;;  %v1314_v32 = vpack.c.bf16 %v345_v27, %v344_v26  ;;  %v347_v34 = vld [vmem:[%s1782_s7 + $0x18] sm:$0xff]  ;;  %v48_v36 = vld [vmem:[%s1781_s2 + $0x8] sm:$0xff] }
   0xa   :  { %1269 = vmatprep.subr.bf16.mxu0 %v1268_v9  ;;  %v1282_v35 = vpack.c.bf16 %v50_v31, %v49_v30  ;;  %v51_v37 = vld [vmem:[%s1783_s3 + $0x10] sm:$0xff]  ;;  %v52_v38 = vld [vmem:[%s1783_s3 + $0x18] sm:$0xff]  ;;  %v1318_v39 = vpack.c.bf16 %v347_v34, %v346_v33  ;;  %v46_v40 = vld [vmem:[%s1779_s1 + $0x8] sm:$0xff]  ;;  %s1417_s1 = smov 64  }
   0xb   :  { %v1286_v41 = vpack.c.bf16 %v52_v38, %v51_v37  ;;  %v43_v42 = vld [vmem:[%s1784_s0] sm:$0xff]  ;;  %v54_v44 = vld [vmem:[%s1783_s3 + $0x28] sm:$0xff]  ;;  %v55_v46 = vld [vmem:[%s1783_s3 + $0x30] sm:$0xff] }
   0xc   :  { %1307 = vmatpush3.bf16.msra.mxu1 %v1304_v17  ;;  %v53_v43 = vld [vmem:[%s1783_s3 + $0x20] sm:$0xff]  ;;  %v56_v47 = vld [vmem:[%s1783_s3 + $0x38] sm:$0x7f]  ;;  %vm1295_vm9 = vmpackc.low %vm160_vm8, %vm1416_vm4 }
   0xd   :  { %1271 = vmatpush3.bf16.msra.mxu0 %v1268_v9  ;;  %1310 = vmatprep.subr.msk.bf16.mxu1 %vm1540_vm5, %v1308_v24  ;;  %v1290_v45 = vpack.c.bf16 %v54_v44, %v53_v43  ;;  %v1294_v48 = vpack.c.bf16 %v56_v47, %v55_v46  ;;  %v44_v49 = vld [vmem:[%s1784_s0 + $0x8] sm:$0xff]  ;;  %v348_v50 = vld [vmem:[%s1782_s7 + $0x20] sm:$0xff]  ;;  %v350_v53 = vld [vmem:[%s1782_s7 + $0x30] sm:$0xff] }
   0xe   :  { %1273 = vmatprep.subr.bf16.mxu0 %v1272_v20  ;;  %v349_v51 = vld [vmem:[%s1782_s7 + $0x28] sm:$0xff]  ;;  %v351_v54 = vld [vmem:[%s1782_s7 + $0x38] sm:$0xff]  ;;  %v958_v58 = vld [vmem:[%s1782_s7 + $0x40] sm:$0xff] }
   0xf   :  { %v1322_v52 = vpack.c.bf16 %v349_v51, %v348_v50  ;;  %v1326_v55 = vpack.c.bf16 %v351_v54, %v350_v53  ;;  %v959_v59 = vld [vmem:[%s1782_s7 + $0x48] sm:$0xff]  ;;  %v954_v62 = vld [vmem:[%s1785_s6] ss:$0 sm:$0xff]  ;;  %v960_v4 = vld [vmem:[%s1782_s7 + $0x50] sm:$0xff] }
  0x10   :  { %1313 = vmatpush3.bf16.msk.msra.mxu1 %vm1540_vm5, %v1308_v24  ;;  %v1330_v60 = vpack.c.bf16 %v959_v59, %v958_v58  ;;  %v961_v5 = vld [vmem:[%s1782_s7 + $0x58] sm:$0xff]  ;;  %v962_v9 = vld [vmem:[%s1782_s7 + $0x60] sm:$0xff]  ;;  %v963_v10 = vld [vmem:[%s1782_s7 + $0x68] sm:$0xff] }
  0x11   :  { %1275 = vmatpush3.bf16.msra.mxu0 %v1272_v20  ;;  %1315 = vmatprep.subr.bf16.mxu1 %v1314_v32  ;;  %v1334_v8 = vpack.c.bf16 %v961_v5, %v960_v4  ;;  %v1338_v11 = vpack.c.bf16 %v963_v10, %v962_v9  ;;  %v964_v12 = vld [vmem:[%s1782_s7 + $0x70] sm:$0xff]  ;;  %v965_v13 = vld [vmem:[%s1782_s7 + $0x78] sm:$0xff]  ;;  %v970_v15 = vld [vmem:[%s1782_s7 + $0x80] sm:$0xff] }
  0x12   :  { %1278 = vmatprep.subr.msk.bf16.mxu0 %vm1551_vm6, %v1276_v28  ;;  %v1342_v14 = vpack.c.bf16 %v965_v13, %v964_v12  ;;  %v971_v16 = vld [vmem:[%s1782_s7 + $0x88] sm:$0xff]  ;;  %v955_v18 = vld [vmem:[%s1786_s8] ss:$0 sm:$0xff]  ;;  %v972_v23 = vld [vmem:[%s1782_s7 + $0x90] sm:$0xff] }
  0x13   :  { %1144 = vmatmul.mubr.msk.f32.vlgmr.msra.gmra.mrb[0].mxu1 %vm245_vm1, %v48_v36  ;;  %v1346_v17 = vpack.c.bf16 %v971_v16, %v970_v15  ;;  %v973_v24 = vld [vmem:[%s1782_s7 + $0x98] sm:$0xff]  ;;  %v975_v29 = vld [vmem:[%s1782_s7 + $0xa8] sm:$0xff]  ;;  %v976_v31 = vld [vmem:[%s1782_s7 + $0xb0] sm:$0xff] }
  0x14   :  { %1317 = vmatpush3.bf16.msra.mxu1 %v1314_v32  ;;  %v1350_v27 = vpack.c.bf16 %v973_v24, %v972_v23  ;;  %v977_v32 = vld [vmem:[%s1782_s7 + $0xb8] sm:$0xff]  ;;  %v643_v34 = vld [vmem:[%s1787_s9] sm:$0xff]  ;;  %v645_v36 = vld [vmem:[%s1787_s9 + $0x10] sm:$0xff] }
  0x15   :  { %1281 = vmatpush3.bf16.msk.msra.mxu0 %vm1551_vm6, %v1276_v28  ;;  %1319 = vmatprep.subr.bf16.mxu1 %v1318_v39  ;;  %v974_v28 = vld [vmem:[%s1782_s7 + $0xa0] sm:$0xff]  ;;  %v1358_v33 = vpack.c.bf16 %v977_v32, %v976_v31  ;;  %v646_v38 = vld [vmem:[%s1787_s9 + $0x18] sm:$0xff]  ;;  %v649_v50 = vld [vmem:[%s1787_s9 + $0x30] sm:$0xff] }
  0x16   :  { %1283 = vmatprep.subr.bf16.mxu0 %v1282_v35  ;;  %v1354_v30 = vpack.c.bf16 %v975_v29, %v974_v28  ;;  %v967_v43 = vld [vmem:[%s1786_s8 + $0x1] ss:$0 sm:$0xff]  ;;  %v650_v51 = vld [vmem:[%s1787_s9 + $0x38] sm:$0xff]  ;;  %v985_v54 = vld [vmem:[%s1782_s7 + $0xc8] sm:$0xff]  ;;  %v17_v28 = vstv %s1789_s11 }
  0x17   :  { %v984_v53 = vld [vmem:[%s1782_s7 + $0xc0] sm:$0xff]  ;;  %v990_v5 = vld [vmem:[%s1782_s7 + $0xf0] sm:$0xff]  ;;  %v843_v9 = vld [vmem:[%s1788_s10 + $0x8] sm:$0xff]  ;;  %18 = vst [vmem:[#allocation2] sm:$0x1] %v17_v28 }
  0x18   :  { %1110 = vmatmul.mubr.msk.f32.vlgmr.msra.gmra.mrb[0].mxu0 %vm67_vm0, %v46_v40  ;;  %1321 = vmatpush3.bf16.msra.mxu1 %v1318_v39  ;;  %v1366_v39 = vpack.c.bf16 %v646_v38, %v645_v36  ;;  %v647_v40 = vld [vmem:[%s1787_s9 + $0x20] sm:$0xff]  ;;  %v844_v10 = vld [vmem:[%s1788_s10 + $0x10] sm:$0xff]  ;;  %v845_v12 = vld [vmem:[%s1788_s10 + $0x18] sm:$0xff] }
  0x19   :  { %1285 = vmatpush3.bf16.msra.mxu0 %v1282_v35  ;;  %1128 = vmatprep.mubr.msk.f32.mxu0 %vm153_vm7, %v43_v42  ;;  %v644_v35 = vld [vmem:[%s1787_s9 + $0x8] sm:$0xff]  ;;  %v988_v59 = vld [vmem:[%s1782_s7 + $0xe0] sm:$0xff]  ;;  %v1398_v13 = vpack.c.bf16 %v845_v12, %v844_v10 }
  0x1a   :  { %1287 = vmatprep.subr.bf16.mxu0 %v1286_v41  ;;  %1323 = vmatprep.subr.bf16.mxu1 %v1322_v52  ;;  %v1362_v37 = vpack.c.bf16 %v644_v35, %v643_v34  ;;  %v847_v15 = vld [vmem:[%s1788_s10 + $0x28] sm:$0xff]  ;;  %v993_v29 = vld [vmem:[%s1786_s8 + $0x3] ss:$0 sm:$0xff] }
  0x1c   :  { %1325 = vmatpush3.bf16.msra.mxu1 %v1322_v52  ;;  %v1374_v52 = vpack.c.bf16 %v650_v51, %v649_v50 }
  0x1d   :  { %1289 = vmatpush3.bf16.msra.mxu0 %v1286_v41  ;;  %1327 = vmatprep.subr.bf16.mxu1 %v1326_v55  ;;  %v648_v41 = vld [vmem:[%s1787_s9 + $0x28] sm:$0xff] }
  0x1e   :  { %1291 = vmatprep.subr.bf16.mxu0 %v1290_v45  ;;  %v1370_v42 = vpack.c.bf16 %v648_v41, %v647_v40  ;;  %v996_v36 = vld [vmem:[#allocation2] ss:$0 sm:$0xff] }
  0x20   :  { %1329 = vmatpush3.bf16.msra.mxu1 %v1326_v55  ;;  %v986_v55 = vld [vmem:[%s1782_s7 + $0xd0] sm:$0xff] }
  0x21   :  { %1293 = vmatpush3.bf16.msra.mxu0 %v1290_v45  ;;  %1331 = vmatprep.subr.bf16.mxu1 %v1330_v60 }
  0x22   :  { %1296 = vmatprep.subr.msk.bf16.mxu0 %vm1295_vm9, %v1294_v48 }
  0x25   :  { %1299 = vmatpush3.bf16.msk.msra.mxu0 %vm1295_vm9, %v1294_v48 }
  0x26   :  { %1363 = vmatprep.subr.bf16.mxu0 %v1362_v37 }
  0x28   :  { %1129 = vmatmul.mubr.msk.f32.vlgmr.msra.gmra.mrb[0].mxu0 %vm153_vm7, %v44_v49 }
  0x29   :  { %1365 = vmatpush3.bf16.msra.mxu0 %v1362_v37 }
  0x2a   :  { %1367 = vmatprep.subr.bf16.mxu0 %v1366_v39 }
  0x2d   :  { %1369 = vmatpush3.bf16.msra.mxu0 %v1366_v39 }
  0x2e   :  { %1371 = vmatprep.subr.bf16.mxu0 %v1370_v42 }
  0x31   :  { %1373 = vmatpush3.bf16.msra.mxu0 %v1370_v42 }
  0x32   :  { %1375 = vmatprep.subr.bf16.mxu0 %v1374_v52 }
  0x35   :  { %1377 = vmatpush3.bf16.msra.mxu0 %v1374_v52 }
  0xe6   :  { %v1145_v56 = vpop.f32.mrb[0].mxu1 }
  0xe7   :  { %v322_v57 = vpop.f32.mrb[1].mxu1 }
  0xfb   :  { %v1130_v61 = vpop.f32.mrb[0].mxu0 }
  0xfc   :  { %v1410_v63 = vadd.f32 %v1145_v56, %v1130_v61  ;;  %v230_v0 = vpop.f32.mrb[1].mxu0  ;;  %v1378_v56 = vpack.c.bf16 %v985_v54, %v984_v53 }
  0xfd   :  { %v1411_v1 = vadd.f32 %v322_v57, %v230_v0  ;;  %v987_v57 = vld [vmem:[%s1782_s7 + $0xd8] sm:$0xff] }
  0xfe   :  { %v341_v2 = vadd.f32 %v1410_v63, %v954_v62  ;;  %v1382_v58 = vpack.c.bf16 %v987_v57, %v986_v55 }
  0xff   :  { %v340_v3 = vadd.f32 %v1411_v1, %v954_v62  ;;  %v979_v62 = vld [vmem:[%s1786_s8 + $0x2] ss:$0 sm:$0xff] }
 0x100   :  { %v343_v7 = vmax.f32 %v341_v2, 0.0 }
 0x101   :  { %653 = vrot.lane.b32.xlu0 %v340_v3, %s1417_s1  ;;  %v342_v6 = vmax.f32 %v340_v3, 0.0 }
 0x103   :  { %1162 = vmatprep.mubr.msk.f32.mxu1 %vm359_vm10, %v342_v6  ;;  %v991_v6 = vld [vmem:[%s1782_s7 + $0xf8] sm:$0xff] }
 0x104   :  { %1163 = vmatmul.mubr.msk.f32.vlgmr.msra.gmra.mrb[2].mxu1 %vm359_vm10, %v343_v7  ;;  %v1390_v7 = vpack.c.bf16 %v991_v6, %v990_v5 }
 0x105   :  { %655 = vrot.lane.b32.xlu0 %v341_v2, %s1417_s1  ;;  %1333 = vmatpush3.bf16.msra.mxu1 %v1330_v60  ;;  %v989_v60 = vld [vmem:[%s1782_s7 + $0xe8] sm:$0xff] }
 0x106   :  { %1335 = vmatprep.subr.bf16.mxu1 %v1334_v8  ;;  %v1386_v61 = vpack.c.bf16 %v989_v60, %v988_v59 }
 0x109   :  { %1337 = vmatpush3.bf16.msra.mxu1 %v1334_v8  ;;  %v842_v8 = vld [vmem:[%s1788_s10] sm:$0xff] }
 0x10a   :  { %1339 = vmatprep.subr.bf16.mxu1 %v1338_v11 }
 0x10d   :  { %1341 = vmatpush3.bf16.msra.mxu1 %v1338_v11  ;;  %v1394_v11 = vpack.c.bf16 %v843_v9, %v842_v8 }
 0x10e   :  { %1343 = vmatprep.subr.bf16.mxu1 %v1342_v14 }
 0x10f   :  { %1395 = vmatprep.subr.bf16.mxu0 %v1394_v11 }
 0x111   :  { %1345 = vmatpush3.bf16.msra.mxu1 %v1342_v14  ;;  %v846_v14 = vld [vmem:[%s1788_s10 + $0x20] sm:$0xff] }
 0x112   :  { %1347 = vmatprep.subr.bf16.mxu1 %v1346_v17  ;;  %v1402_v16 = vpack.c.bf16 %v847_v15, %v846_v14 }
 0x1d7   :  { %v1164_v19 = vpop.f32.mrb[2].mxu1 }
 0x1d8   :  { %v438_v20 = vadd.f32 %v1164_v19, %v955_v18  ;;  %v432_v21 = vpop.f32.mrb[3].mxu1 }
 0x1d9   :  { %v433_v22 = vadd.f32 %v955_v18, %v432_v21 }
 0x1da   :  { %v442_v26 = vmax.f32 %v438_v20, 0.0 }
 0x1db   :  { %v441_v25 = vmax.f32 %v433_v22, 0.0 }
 0x1dd   :  { %1181 = vmatprep.mubr.msk.f32.mxu1 %vm359_vm10, %v441_v25  ;;  %v848_v25 = vld [vmem:[%s1788_s10 + $0x30] sm:$0xff] }
 0x1de   :  { %1182 = vmatmul.mubr.msk.f32.vlgmr.msra.gmra.mrb[4].mxu1 %vm359_vm10, %v442_v26  ;;  %v849_v26 = vld [vmem:[%s1788_s10 + $0x38] sm:$0xff] }
 0x1df   :  { %1349 = vmatpush3.bf16.msra.mxu1 %v1346_v17  ;;  %v654_v17 = vpop.permute.xlu0 %653 }
 0x1e0   :  { %1351 = vmatprep.subr.bf16.mxu1 %v1350_v27 }
 0x1e3   :  { %1353 = vmatpush3.bf16.msra.mxu1 %v1350_v27  ;;  %v656_v18 = vpop.permute.xlu0 %655  ;;  %v1406_v27 = vpack.c.bf16 %v849_v26, %v848_v25 }
 0x1e4   :  { %1355 = vmatprep.subr.bf16.mxu1 %v1354_v30 }
 0x1e7   :  { %1357 = vmatpush3.bf16.msra.mxu1 %v1354_v30 }
 0x1e8   :  { %1359 = vmatprep.subr.bf16.mxu1 %v1358_v33 }
 0x1eb   :  { %1361 = vmatpush3.bf16.msra.mxu1 %v1358_v33 }
 0x1ec   :  { %1379 = vmatprep.subr.bf16.mxu1 %v1378_v56 }
 0x2b1   :  { %v1183_v44 = vpop.f32.mrb[4].mxu1 }
 0x2b2   :  { %v538_v45 = vadd.f32 %v1183_v44, %v967_v43  ;;  %v532_v46 = vpop.f32.mrb[5].mxu1 }
 0x2b3   :  { %v533_v47 = vadd.f32 %v967_v43, %v532_v46 }
 0x2b4   :  { %v542_v49 = vmax.f32 %v538_v45, 0.0 }
 0x2b5   :  { %v541_v48 = vmax.f32 %v533_v47, 0.0 }
 0x2b7   :  { %1200 = vmatprep.mubr.msk.f32.mxu1 %vm359_vm10, %v541_v48 }
 0x2b8   :  { %1201 = vmatmul.mubr.msk.f32.vlgmr.msra.gmra.mrb[6].mxu1 %vm359_vm10, %v542_v49 }
 0x2b9   :  { %1381 = vmatpush3.bf16.msra.mxu1 %v1378_v56 }
 0x2ba   :  { %1383 = vmatprep.subr.bf16.mxu1 %v1382_v58 }
 0x2bd   :  { %1385 = vmatpush3.bf16.msra.mxu1 %v1382_v58 }
 0x2be   :  { %1387 = vmatprep.subr.bf16.mxu1 %v1386_v61 }
 0x2c1   :  { %1389 = vmatpush3.bf16.msra.mxu1 %v1386_v61 }
 0x2c2   :  { %1391 = vmatprep.subr.bf16.mxu1 %v1390_v7 }
 0x2c5   :  { %1393 = vmatpush3.bf16.msra.mxu1 %v1390_v7 }
 0x38b   :  { %v1202_v63 = vpop.f32.mrb[6].mxu1 }
 0x38c   :  { %v638_v0 = vadd.f32 %v1202_v63, %v979_v62  ;;  %v632_v1 = vpop.f32.mrb[7].mxu1 }
 0x38d   :  { %v633_v2 = vadd.f32 %v979_v62, %v632_v1 }
 0x38e   :  { %v642_v4 = vmax.f32 %v638_v0, 0.0 }
 0x38f   :  { %v641_v3 = vmax.f32 %v633_v2, 0.0 }
 0x391   :  { %1219 = vmatprep.mubr.msk.f32.mxu0 %vm359_vm10, %v641_v3 }
 0x392   :  { %1220 = vmatmul.mubr.msk.f32.vlgmr.msra.gmra.mrb[2].mxu0 %vm359_vm10, %v642_v4 }
 0x393   :  { %1397 = vmatpush3.bf16.msra.mxu0 %v1394_v11 }
 0x394   :  { %1399 = vmatprep.subr.bf16.mxu0 %v1398_v13 }
 0x397   :  { %1401 = vmatpush3.bf16.msra.mxu0 %v1398_v13 }
 0x398   :  { %1403 = vmatprep.subr.bf16.mxu0 %v1402_v16 }
 0x39b   :  { %1405 = vmatpush3.bf16.msra.mxu0 %v1402_v16 }
 0x39c   :  { %1407 = vmatprep.subr.bf16.mxu0 %v1406_v27 }
 0x39f   :  { %1409 = vmatpush3.bf16.msra.mxu0 %v1406_v27 }
 0x465   :  { %v1221_v19 = vpop.f32.mrb[2].mxu0 }
 0x466   :  { %v737_v20 = vadd.f32 %v1221_v19, %v656_v18  ;;  %v731_v21 = vpop.f32.mrb[3].mxu0 }
 0x467   :  { %v732_v22 = vadd.f32 %v731_v21, %v654_v17 }
 0x468   :  { %v741_v24 = vmax.f32 %v737_v20, 0.0 }
 0x469   :  { %v740_v23 = vmax.f32 %v732_v22, 0.0 }
 0x46b   :  { %1238 = vmatprep.mubr.msk.f32.mxu1 %vm359_vm10, %v740_v23 }
 0x46c   :  { %1239 = vmatmul.mubr.msk.f32.vlgmr.msra.gmra.mrb[8].mxu1 %vm359_vm10, %v741_v24 }
 0x53f   :  { %v1240_v30 = vpop.f32.mrb[8].mxu1 }
 0x540   :  { %v837_v31 = vadd.f32 %v1240_v30, %v993_v29  ;;  %v831_v32 = vpop.f32.mrb[9].mxu1 }
 0x541   :  { %v832_v33 = vadd.f32 %v993_v29, %v831_v32 }
 0x542   :  { %v841_v35 = vmax.f32 %v837_v31, 0.0 }
 0x543   :  { %v840_v34 = vmax.f32 %v832_v33, 0.0 }
 0x545   :  { %1257 = vmatprep.mubr.msk.f32.mxu0 %vm359_vm10, %v840_v34 }
 0x546   :  { %1258 = vmatmul.mubr.msk.f32.vlgmr.msra.gmra.mrb[4].mxu0 %vm359_vm10, %v841_v35 }
 0x619   :  { %v1259_v37 = vpop.f32.mrb[4].mxu0 }
 0x61a   :  { %v935_v38 = vadd.f32 %v1259_v37, %v996_v36  ;;  %v929_v39 = vpop.f32.mrb[5].mxu0 }
 0x61b   :  { %v930_v40 = vadd.f32 %v996_v36, %v929_v39 }
 0x61c   :  { %940 = vst.msk [vmem:[%s1790_s12 + $0x8] sm:$0xff] %vm938_vm11, %v935_v38 }
 0x61d   :  { %939 = vst.msk [vmem:[%s1790_s12] sm:$0xff] %vm938_vm11, %v930_v40 }

</bundles_post_ra>
